<compile_context>
chip_gen: v7x
topology: tpu7x:2x2x1
jax: 0.10.0
libtpu: 0.0.40
codegen_flags: <defaults>
</compile_context>

<pallas_src>
import jax
import jax.numpy as jnp
from jax import lax
from jax.experimental import pallas as pl
from jax.experimental.pallas import tpu as pltpu

_LANE = 128


def _round_up(x, m):
    return -(-x // m) * m


def _physical_vmem_bytes():
    """Per-core VMEM capacity (generation aware), conservative fallback."""
    try:
        info = pltpu.get_tpu_info()
        for attr in ("vmem_capacity_bytes", "vmem_bytes", "vmem_size_bytes"):
            v = getattr(info, attr, None)
            if v:
                return int(v)
    except Exception:
        pass
    return 64 * 1024 * 1024  # v7x per-TC VMEM (smallest of v5e/v6e/v7x)


def _feature_embedding_kernel(idx_ref, val_ref, table_t_ref, out_ref, acc_ref):
    """Grid step (i, k): row-tile i of the flattened B*F problem, N-chunk k.

    out_T[:, r] = table[idx[r], :] * val[r]      (output transposed: (D, rows))

    Gather = {0,1} one-hot matmul on the MXU in the table's native dtype
    (exact); feature_value applied as a post-matmul (D, tm) VPU multiply.
    OOB idx -> zero output row (contract differs from nn.Embedding).
    """
    k = pl.program_id(1)
    nk = table_t_ref.shape[1]            # static N-chunk size

    @pl.when(k == 0)
    def _():
        acc_ref[...] = jnp.zeros_like(acc_ref)

    idx = idx_ref[0]                     # (1, tm) int32, lane-dense
    tm = idx.shape[-1]
    table_t = table_t_ref[...]           # (D, nk), native dtype (no upcast)

    # Transposed one-hot for this chunk: sublanes = feature id, lanes = row.
    feat = lax.broadcasted_iota(jnp.int32, (nk, tm), 0) + k * nk
    onehot_t = (feat == idx).astype(table_t.dtype)           # exact {0, 1}

    # MXU gather: (D, nk) @ (nk, tm) -> (D, tm), f32 accumulation over chunks.
    acc_ref[...] += jnp.dot(table_t, onehot_t, preferred_element_type=jnp.float32)

    @pl.when(k == pl.num_programs(1) - 1)
    def _():
        val = val_ref[0].astype(jnp.float32)                  # (1, tm)
        out_ref[...] = (acc_ref[...] * val).astype(out_ref.dtype)


def feature_embedding(feature_idx, feature_value, table, *,
                      block_rows=512, n_chunk=512):
    """out[b, f, :] = table[feature_idx[b, f], :] * feature_value[b, f]."""
    B, F = feature_idx.shape
    N, D = table.shape
    rows = B * F

    # ---- row tiling (lane axis of the transposed output) -------------------
    block_rows = _round_up(max(int(block_rows), _LANE), _LANE)
    if rows >= 2 * _LANE:
        # >= 2 lane-dense tiles so both v7x TensorCores get work.
        tm = min(block_rows, _round_up(pl.cdiv(rows, 2), _LANE))
    else:
        # Tiny problem: one full-extent tile, no padding / wasted work.
        tm = rows
    n_tiles = pl.cdiv(rows, tm)
    rows_pad = n_tiles * tm

    # ---- N (feature-id) chunking: bounds the (nk, tm) one-hot --------------
    nk = min(N, int(n_chunk))
    n_kchunks = pl.cdiv(N, nk)
    n_pad = n_kchunks * nk

    # ---- operand layout -----------------------------------------------------
    # idx/val: lane-dense (n_tiles, 1, tm); each step DMAs one contiguous
    # 128-aligned lane row instead of a (tm, 1) sublane-strided copy.
    idx = feature_idx.reshape(rows).astype(jnp.int32)
    val = feature_value.reshape(rows).astype(jnp.float32)
    if rows_pad != rows:
        # Padded rows: idx=0 / val=0 -> zero output columns (sliced off below).
        idx = jnp.pad(idx, (0, rows_pad - rows))
        val = jnp.pad(val, (0, rows_pad - rows))
    idx = idx.reshape(n_tiles, 1, tm)
    val = val.reshape(n_tiles, 1, tm)

    # Table passed pre-transposed (D, N): contraction over N, lane-dense (D, tm)
    # output tile (rows on lanes) -> unmasked stores even when D << 128.
    table_t = table.T
    if n_pad != N:
        # Zero-pad (never garbage) so padded feature ids contribute exactly 0.
        table_t = jnp.pad(table_t, ((0, 0), (0, n_pad - N)))

    # ---- VMEM budget (lane/sublane padded, generation aware) ---------------
    t_item = jnp.dtype(table.dtype).itemsize
    tm_l = _round_up(tm, _LANE)
    d_s = _round_up(D, 8)
    nk_s = _round_up(nk, 8)
    nk_l = _round_up(nk, _LANE)
    table_bufs = 1 if n_kchunks == 1 else 2
    vmem_need = (
        table_bufs * d_s * nk_l * t_item   # table chunk buffer(s)
        + 2 * 2 * 8 * tm_l * 4             # idx + val blocks, 2 bufs, sublane-padded to 8
        + 2 * d_s * tm_l * t_item          # output block, double buffered
        + d_s * tm_l * 4                   # f32 accumulator scratch
        + nk_s * tm_l * (t_item + 4)       # live one-hot + int compare temporaries
        + d_s * tm_l * 4                   # f32 matmul result tile
        + (2 << 20)                        # headroom / compiler internal scratch
    )
    vmem_cap = (_physical_vmem_bytes() * 3) // 4
    vmem_limit = int(min(vmem_cap, max(8 << 20, vmem_need)))
    # TODO(synk): if vmem_need > vmem_cap (very large D), fall back to an
    # HBM-resident table gather path (pl.ANY + manual row DMAs).

    def _call(single_buffer_table):
        if single_buffer_table:
            table_spec = pl.BlockSpec((D, nk), lambda i, k: (0, k),
                                      pipeline_mode=pl.Buffered(1))
        else:
            table_spec = pl.BlockSpec((D, nk), lambda i, k: (0, k))
        return pl.pallas_call(
            _feature_embedding_kernel,
            out_shape=jax.ShapeDtypeStruct((D, rows_pad), table.dtype),
            grid=(n_tiles, n_kchunks),
            in_specs=[
                pl.BlockSpec((1, 1, tm), lambda i, k: (i, 0, 0)),   # feature_idx rows
                pl.BlockSpec((1, 1, tm), lambda i, k: (i, 0, 0)),   # feature_value rows
                table_spec,                                          # table^T N-chunk
            ],
            out_specs=pl.BlockSpec((D, tm), lambda i, k: (0, i)),
            scratch_shapes=[pltpu.VMEM((D, tm), jnp.float32)],
            compiler_params=pltpu.CompilerParams(
                dimension_semantics=("parallel", "arbitrary"),
                vmem_limit_bytes=vmem_limit,
            ),
        )(idx, val, table_t)

    # Resident table (single N-chunk) only needs one pipeline buffer; fall back
    # to default double buffering if this Pallas version rejects Buffered(1).
    try:
        out_t = _call(single_buffer_table=(n_kchunks == 1))
    except Exception:  # defensive fallback, differs only in pipeline_mode
        out_t = _call(single_buffer_table=False)

    # (D, rows) -> (rows, D) -> (B, F, D): one cheap wrapper-side pass over the
    # small-D output, instead of masked 32/128-lane stores inside the kernel.
    return out_t[:, :rows].T.reshape(B, F, D)


def feature_embedding_ref(feature_idx, feature_value, table):
    # Pure-JAX reference (matches PyTorch: weight(idx) * value.unsqueeze(-1)).
    return table[feature_idx] * feature_value[..., None]


if __name__ == "__main__":
    key = jax.random.PRNGKey(0)
    k_tab, k_idx, k_val = jax.random.split(key, 3)

    batch = 2
    num_fields = 8
    num_features = 16
    embedding_dim = 32

    # Deterministic parameter init (nn.Embedding default: N(0, 1)).
    table = jax.random.normal(k_tab, (num_features, embedding_dim), dtype=jnp.float32)

    feature_idx = jax.random.randint(
        k_idx, (batch, num_fields), minval=0, maxval=num_features, dtype=jnp.int32
    )
    feature_value = jax.random.uniform(k_val, (batch, num_fields), dtype=jnp.float32)

    out = feature_embedding(feature_idx, feature_value, table)
    out = jax.block_until_ready(out)

    ref = feature_embedding_ref(feature_idx, feature_value, table)
    assert out.shape == (batch, num_fields, embedding_dim), out.shape
    assert jnp.allclose(out, ref, atol=1e-5, rtol=1e-5), "mismatch vs reference"

    print("KERNEL_OK")
</pallas_src>

<mosaic_0001>
module attributes {stable_mosaic.version = 11 : i64} {
  func.func @_feature_embedding_kernel(%arg0: i32, %arg1: i32, %arg2: memref<1x1x16xi32, #tpu.memory_space<vmem>>, %arg3: memref<1x1x16xf32, #tpu.memory_space<vmem>>, %arg4: memref<32x16xf32, #tpu.memory_space<vmem>>, %arg5: memref<32x16xf32, #tpu.memory_space<vmem>>, %arg6: memref<32x16xf32, #tpu.memory_space<vmem>>) attributes {dimension_semantics = [#tpu.dimension_semantics<parallel>, #tpu.dimension_semantics<arbitrary>], iteration_bounds = array<i64: 1, 1>, scalar_prefetch = 0 : i64, scratch_operands = 1 : i64, tpu.core_type = #tpu.core_type<tc>, window_params = [{transform_indices = @transform_0, window_bounds = array<i64: 1, 1, 16>}, {transform_indices = @transform_1, window_bounds = array<i64: 1, 1, 16>}, {pipeline_mode = #tpu.pipeline_mode<synchronous>, transform_indices = @transform_2, window_bounds = array<i64: 32, 16>}, {transform_indices = @transform_3, window_bounds = array<i64: 32, 16>}]} {
    %c0_i32 = arith.constant 0 : i32
    %0 = arith.cmpi eq, %arg1, %c0_i32 : i32
    %1 = arith.extui %0 : i1 to i32
    %c0_i32_0 = arith.constant 0 : i32
    %2 = arith.cmpi ne, %1, %c0_i32_0 : i32
    scf.if %2 {
      %cst_11 = arith.constant 0.000000e+00 : f32
      %21 = vector.broadcast %cst_11 : f32 to vector<32x16xf32>
      %c0_12 = arith.constant 0 : index
      %c0_13 = arith.constant 0 : index
      %22 = vector.load %arg6[%c0_12, %c0_13] : memref<32x16xf32, #tpu.memory_space<vmem>>, vector<32x16xf32>
      tpu.vector_store %arg6[%c0_12, %c0_13], %21 {strides = array<i32>} : memref<32x16xf32, #tpu.memory_space<vmem>>, vector<32x16xf32>,
    } else {
    }
    %c0 = arith.constant 0 : index
    %c0_1 = arith.constant 0 : index
    %c0_2 = arith.constant 0 : index
    %3 = vector.load %arg2[%c0, %c0_1, %c0_2] : memref<1x1x16xi32, #tpu.memory_space<vmem>>, vector<1x1x16xi32>
    %4 = vector.shape_cast %3 : vector<1x1x16xi32> to vector<1x16xi32>
    %c0_3 = arith.constant 0 : index
    %c0_4 = arith.constant 0 : index
    %5 = vector.load %arg4[%c0_3, %c0_4] : memref<32x16xf32, #tpu.memory_space<vmem>>, vector<32x16xf32>
    %6 = tpu.iota {dimensions = array<i32: 0>} : vector<16x16xi32>
    %c16_i32 = arith.constant 16 : i32
    %7 = arith.muli %arg1, %c16_i32 : i32
    %8 = vector.broadcast %7 : i32 to vector<16x16xi32>
    %9 = arith.addi %6, %8 : vector<16x16xi32>
    %10 = vector.broadcast %4 : vector<1x16xi32> to vector<16x16xi32>
    %11 = arith.cmpi eq, %9, %10 : vector<16x16xi32>
    %12 = arith.extui %11 : vector<16x16xi1> to vector<16x16xi32>
    %13 = arith.sitofp %12 : vector<16x16xi32> to vector<16x16xf32>
    %c0_5 = arith.constant 0 : index
    %c0_6 = arith.constant 0 : index
    %14 = vector.load %arg6[%c0_5, %c0_6] : memref<32x16xf32, #tpu.memory_space<vmem>>, vector<32x16xf32>
    %cst = arith.constant dense<0.000000e+00> : vector<32x16xf32>
    %15 = tpu.matmul %5, %13, %cst {dimension_numbers = #tpu.dot_dimension_numbers<[1], [0], [0], [1], [0, 0, 1, 1], [], []>} : vector<32x16xf32>, vector<16x16xf32>, vector<32x16xf32> -> vector<32x16xf32>
    %16 = arith.addf %14, %15 : vector<32x16xf32>
    %c0_7 = arith.constant 0 : index
    %c0_8 = arith.constant 0 : index
    %17 = vector.load %arg6[%c0_7, %c0_8] : memref<32x16xf32, #tpu.memory_space<vmem>>, vector<32x16xf32>
    tpu.vector_store %arg6[%c0_7, %c0_8], %16 {strides = array<i32>} : memref<32x16xf32, #tpu.memory_space<vmem>>, vector<32x16xf32>,
    %c0_i32_9 = arith.constant 0 : i32
    %18 = arith.cmpi eq, %arg1, %c0_i32_9 : i32
    %19 = arith.extui %18 : i1 to i32
    %c0_i32_10 = arith.constant 0 : i32
    %20 = arith.cmpi ne, %19, %c0_i32_10 : i32
    scf.if %20 {
      %c0_11 = arith.constant 0 : index
      %c0_12 = arith.constant 0 : index
      %c0_13 = arith.constant 0 : index
      %21 = vector.load %arg3[%c0_11, %c0_12, %c0_13] : memref<1x1x16xf32, #tpu.memory_space<vmem>>, vector<1x1x16xf32>
      %22 = vector.shape_cast %21 : vector<1x1x16xf32> to vector<1x16xf32>
      %c0_14 = arith.constant 0 : index
      %c0_15 = arith.constant 0 : index
      %23 = vector.load %arg6[%c0_14, %c0_15] : memref<32x16xf32, #tpu.memory_space<vmem>>, vector<32x16xf32>
      %24 = vector.broadcast %22 : vector<1x16xf32> to vector<32x16xf32>
      %25 = arith.mulf %23, %24 : vector<32x16xf32>
      %c0_16 = arith.constant 0 : index
      %c0_17 = arith.constant 0 : index
      %26 = vector.load %arg5[%c0_16, %c0_17] : memref<32x16xf32, #tpu.memory_space<vmem>>, vector<32x16xf32>
      tpu.vector_store %arg5[%c0_16, %c0_17], %25 {strides = array<i32>} : memref<32x16xf32, #tpu.memory_space<vmem>>, vector<32x16xf32>,
    } else {
    }
    return
  }
  func.func @transform_0(%arg0: i32, %arg1: i32) -> (i32, i32, i32) {
    %c0_i32 = arith.constant 0 : i32
    %c0_i32_0 = arith.constant 0 : i32
    %c0_i32_1 = arith.constant 0 : i32
    return %arg0, %c0_i32, %c0_i32_0 : i32, i32, i32
  }
  func.func @transform_1(%arg0: i32, %arg1: i32) -> (i32, i32, i32) {
    %c0_i32 = arith.constant 0 : i32
    %c0_i32_0 = arith.constant 0 : i32
    %c0_i32_1 = arith.constant 0 : i32
    return %arg0, %c0_i32, %c0_i32_0 : i32, i32, i32
  }
  func.func @transform_2(%arg0: i32, %arg1: i32) -> (i32, i32) {
    %c0_i32 = arith.constant 0 : i32
    %c0_i32_0 = arith.constant 0 : i32
    return %c0_i32, %arg1 : i32, i32
  }
  func.func @transform_3(%arg0: i32, %arg1: i32) -> (i32, i32) {
    %c0_i32 = arith.constant 0 : i32
    %c0_i32_0 = arith.constant 0 : i32
    return %c0_i32, %arg0 : i32, i32
  }
}

module attributes {stable_mosaic.version = 11 : i64} {
  func.func @_feature_embedding_kernel(%arg0: i32, %arg1: i32, %arg2: memref<1x1x16xi32, #tpu.memory_space<vmem>>, %arg3: memref<1x1x16xf32, #tpu.memory_space<vmem>>, %arg4: memref<32x16xf32, #tpu.memory_space<vmem>>, %arg5: memref<32x16xf32, #tpu.memory_space<vmem>>, %arg6: memref<32x16xf32, #tpu.memory_space<vmem>>) attributes {dimension_semantics = [#tpu.dimension_semantics<parallel>, #tpu.dimension_semantics<arbitrary>], iteration_bounds = array<i64: 1, 1>, scalar_prefetch = 0 : i64, scratch_operands = 1 : i64, tpu.core_type = #tpu.core_type<tc>, window_params = [{transform_indices = @transform_0, window_bounds = array<i64: 1, 1, 16>}, {transform_indices = @transform_1, window_bounds = array<i64: 1, 1, 16>}, {transform_indices = @transform_2, window_bounds = array<i64: 32, 16>}, {transform_indices = @transform_3, window_bounds = array<i64: 32, 16>}]} {
    %c0_i32 = arith.constant 0 : i32
    %0 = arith.cmpi eq, %arg1, %c0_i32 : i32
    %1 = arith.extui %0 : i1 to i32
    %c0_i32_0 = arith.constant 0 : i32
    %2 = arith.cmpi ne, %1, %c0_i32_0 : i32
    scf.if %2 {
      %cst_11 = arith.constant 0.000000e+00 : f32
      %21 = vector.broadcast %cst_11 : f32 to vector<32x16xf32>
      %c0_12 = arith.constant 0 : index
      %c0_13 = arith.constant 0 : index
      %22 = vector.load %arg6[%c0_12, %c0_13] : memref<32x16xf32, #tpu.memory_space<vmem>>, vector<32x16xf32>
      tpu.vector_store %arg6[%c0_12, %c0_13], %21 {strides = array<i32>} : memref<32x16xf32, #tpu.memory_space<vmem>>, vector<32x16xf32>,
    } else {
    }
    %c0 = arith.constant 0 : index
    %c0_1 = arith.constant 0 : index
    %c0_2 = arith.constant 0 : index
    %3 = vector.load %arg2[%c0, %c0_1, %c0_2] : memref<1x1x16xi32, #tpu.memory_space<vmem>>, vector<1x1x16xi32>
    %4 = vector.shape_cast %3 : vector<1x1x16xi32> to vector<1x16xi32>
    %c0_3 = arith.constant 0 : index
    %c0_4 = arith.constant 0 : index
    %5 = vector.load %arg4[%c0_3, %c0_4] : memref<32x16xf32, #tpu.memory_space<vmem>>, vector<32x16xf32>
    %6 = tpu.iota {dimensions = array<i32: 0>} : vector<16x16xi32>
    %c16_i32 = arith.constant 16 : i32
    %7 = arith.muli %arg1, %c16_i32 : i32
    %8 = vector.broadcast %7 : i32 to vector<16x16xi32>
    %9 = arith.addi %6, %8 : vector<16x16xi32>
    %10 = vector.broadcast %4 : vector<1x16xi32> to vector<16x16xi32>
    %11 = arith.cmpi eq, %9, %10 : vector<16x16xi32>
    %12 = arith.extui %11 : vector<16x16xi1> to vector<16x16xi32>
    %13 = arith.sitofp %12 : vector<16x16xi32> to vector<16x16xf32>
    %c0_5 = arith.constant 0 : index
    %c0_6 = arith.constant 0 : index
    %14 = vector.load %arg6[%c0_5, %c0_6] : memref<32x16xf32, #tpu.memory_space<vmem>>, vector<32x16xf32>
    %cst = arith.constant dense<0.000000e+00> : vector<32x16xf32>
    %15 = tpu.matmul %5, %13, %cst {dimension_numbers = #tpu.dot_dimension_numbers<[1], [0], [0], [1], [0, 0, 1, 1], [], []>} : vector<32x16xf32>, vector<16x16xf32>, vector<32x16xf32> -> vector<32x16xf32>
    %16 = arith.addf %14, %15 : vector<32x16xf32>
    %c0_7 = arith.constant 0 : index
    %c0_8 = arith.constant 0 : index
    %17 = vector.load %arg6[%c0_7, %c0_8] : memref<32x16xf32, #tpu.memory_space<vmem>>, vector<32x16xf32>
    tpu.vector_store %arg6[%c0_7, %c0_8], %16 {strides = array<i32>} : memref<32x16xf32, #tpu.memory_space<vmem>>, vector<32x16xf32>,
    %c0_i32_9 = arith.constant 0 : i32
    %18 = arith.cmpi eq, %arg1, %c0_i32_9 : i32
    %19 = arith.extui %18 : i1 to i32
    %c0_i32_10 = arith.constant 0 : i32
    %20 = arith.cmpi ne, %19, %c0_i32_10 : i32
    scf.if %20 {
      %c0_11 = arith.constant 0 : index
      %c0_12 = arith.constant 0 : index
      %c0_13 = arith.constant 0 : index
      %21 = vector.load %arg3[%c0_11, %c0_12, %c0_13] : memref<1x1x16xf32, #tpu.memory_space<vmem>>, vector<1x1x16xf32>
      %22 = vector.shape_cast %21 : vector<1x1x16xf32> to vector<1x16xf32>
      %c0_14 = arith.constant 0 : index
      %c0_15 = arith.constant 0 : index
      %23 = vector.load %arg6[%c0_14, %c0_15] : memref<32x16xf32, #tpu.memory_space<vmem>>, vector<32x16xf32>
      %24 = vector.broadcast %22 : vector<1x16xf32> to vector<32x16xf32>
      %25 = arith.mulf %23, %24 : vector<32x16xf32>
      %c0_16 = arith.constant 0 : index
      %c0_17 = arith.constant 0 : index
      %26 = vector.load %arg5[%c0_16, %c0_17] : memref<32x16xf32, #tpu.memory_space<vmem>>, vector<32x16xf32>
      tpu.vector_store %arg5[%c0_16, %c0_17], %25 {strides = array<i32>} : memref<32x16xf32, #tpu.memory_space<vmem>>, vector<32x16xf32>,
    } else {
    }
    return
  }
  func.func @transform_0(%arg0: i32, %arg1: i32) -> (i32, i32, i32) {
    %c0_i32 = arith.constant 0 : i32
    %c0_i32_0 = arith.constant 0 : i32
    %c0_i32_1 = arith.constant 0 : i32
    return %arg0, %c0_i32, %c0_i32_0 : i32, i32, i32
  }
  func.func @transform_1(%arg0: i32, %arg1: i32) -> (i32, i32, i32) {
    %c0_i32 = arith.constant 0 : i32
    %c0_i32_0 = arith.constant 0 : i32
    %c0_i32_1 = arith.constant 0 : i32
    return %arg0, %c0_i32, %c0_i32_0 : i32, i32, i32
  }
  func.func @transform_2(%arg0: i32, %arg1: i32) -> (i32, i32) {
    %c0_i32 = arith.constant 0 : i32
    %c0_i32_0 = arith.constant 0 : i32
    return %c0_i32, %arg1 : i32, i32
  }
  func.func @transform_3(%arg0: i32, %arg1: i32) -> (i32, i32) {
    %c0_i32 = arith.constant 0 : i32
    %c0_i32_0 = arith.constant 0 : i32
    return %c0_i32, %arg0 : i32, i32
  }
}

</mosaic_0001>

<bundles_post_ra>
// kernel: tpu_custom_call.1
= control target key start
LH: loop header
LB: loop body
LE: loop exit
PB: predicated region body
PF: predicated region fallthrough
CT: control target
= control target key end

     0   :  { %v28_v0 = vlaneseq  ;;  %vm18_vm0 = vcmask 130048   ;;  %v215_v4 = vmov 0.0   ;;  %v216_v7 = vmov 1.0|1.0   ;;  %s283_s0 = inlined_call_operand.vmem [shape: s32[1,1,16], index: 0, kind: input, shape index: {}]   ;;  %s284_s2 = inlined_call_operand.vmem [shape: f32[32,16], index: 2, kind: input, shape index: {}]   ;;  %s285_s1 = inlined_call_operand.vmem [shape: f32[1,1,16], index: 1, kind: input, shape index: {}]   ;;  %s286_s3 = inlined_call_operand.vmem [shape: f32[32,16], index: 3, kind: output, shape index: {}]  }
   0x1   :  { %v181_v1 = vld [vmem:[%s283_s0] ss:$0 sm:$0xff]  ;;  %v26_v3 = vld [vmem:[%s284_s2 + $0x10] sm:$0xff]  ;;  %20 = vst.msk [vmem:[#allocation2 + $0x8] sm:$0xff] %vm18_vm0, %v215_v4  ;;  %19 = vst.msk [vmem:[#allocation2] sm:$0xff] %vm18_vm0, %v215_v4 }
   0x2   :  { %v24_v2 = vld [vmem:[%s284_s2] sm:$0xff]  ;;  %21 = vst.msk [vmem:[#allocation2 + $0x10] sm:$0xff] %vm18_vm0, %v215_v4  ;;  %22 = vst.msk [vmem:[#allocation2 + $0x18] sm:$0xff] %vm18_vm0, %v215_v4  ;;  %v29_v5 = vshrl.u32 %v28_v0, 7  ;;  %204 = vmatprep.mubr.msk.f32.mxu1 %vm18_vm0, %v26_v3  ;;  %v25_v8 = vld [vmem:[%s284_s2 + $0x8] sm:$0xff] }
   0x3   :  { %201 = vmatprep.mubr.msk.f32.mxu0 %vm18_vm0, %v24_v2  ;;  %v27_v9 = vld [vmem:[%s284_s2 + $0x18] sm:$0xff]  ;;  %v190_v22 = vld [vmem:[%s285_s1] ss:$0 sm:$0xff] }
   0x4   :  { %v30_v6 = vadd.s32 8, %v29_v5  ;;  %vm39_vm1 = vcmp.eq.s32.totalorder %v29_v5, %v181_v1 }
   0x6   :  { %vm40_vm2 = vcmp.eq.s32.totalorder %v30_v6, %v181_v1 }
   0x7   :  { %vm207_vm3 = vmpackc.low %vm40_vm2, %vm39_vm1 }
   0x8   :  { %208 = vmatprep.subr.msk.bf16.mxu0 %vm207_vm3, %v216_v7  ;;  %211 = vmatprep.subr.msk.bf16.mxu1 %vm207_vm3, %v216_v7  ;;  %v46_v10 = vld [vmem:[#allocation2 + $0x8] sm:$0xff]  ;;  %v45_v12 = vld [vmem:[#allocation2] sm:$0xff] }
   0x9   :  { %210 = vmatpush3.bf16.msk.msra.mxu0 %vm207_vm3, %v216_v7  ;;  %212 = vmatpush3.bf16.msk.msra.mxu1 %vm207_vm3, %v216_v7  ;;  %v48_v11 = vld [vmem:[#allocation2 + $0x18] sm:$0xff]  ;;  %v47_v13 = vld [vmem:[#allocation2 + $0x10] sm:$0xff] }
   0xc   :  { %202 = vmatmul.mubr.msk.f32.vlgmr.msra.gmra.mrb[0].mxu0 %vm18_vm0, %v25_v8  ;;  %205 = vmatmul.mubr.msk.f32.vlgmr.msra.gmra.mrb[0].mxu1 %vm18_vm0, %v27_v9 }
  0xdf   :  { %v203_v14 = vpop.f32.mrb[0].mxu0  ;;  %v206_v15 = vpop.f32.mrb[0].mxu1 }
  0xe0   :  { %v148_v16 = vadd.f32 %v203_v14, %v46_v10  ;;  %v150_v17 = vadd.f32 %v206_v15, %v48_v11  ;;  %v128_v18 = vpop.f32.mrb[1].mxu0  ;;  %v138_v19 = vpop.f32.mrb[1].mxu1 }
  0xe1   :  { %v147_v20 = vadd.f32 %v128_v18, %v45_v12  ;;  %v149_v21 = vadd.f32 %v138_v19, %v47_v13 }
  0xe2   :  { %152 = vst.msk [vmem:[#allocation2 + $0x8] sm:$0xff] %vm18_vm0, %v148_v16  ;;  %154 = vst.msk [vmem:[#allocation2 + $0x18] sm:$0xff] %vm18_vm0, %v150_v17 }
  0xe3   :  { %151 = vst.msk [vmem:[#allocation2] sm:$0xff] %vm18_vm0, %v147_v20  ;;  %153 = vst.msk [vmem:[#allocation2 + $0x10] sm:$0xff] %vm18_vm0, %v149_v21 }
  0xe9   :  { %v160_v23 = vld [vmem:[#allocation2 + $0x8] sm:$0xff]  ;;  %v162_v24 = vld [vmem:[#allocation2 + $0x18] sm:$0xff] }
  0xea   :  { %v170_v25 = vmul.f32 %v190_v22, %v160_v23  ;;  %v172_v26 = vmul.f32 %v190_v22, %v162_v24  ;;  %v159_v27 = vld [vmem:[#allocation2] sm:$0xff]  ;;  %v161_v28 = vld [vmem:[#allocation2 + $0x10] sm:$0xff] }
  0xeb   :  { %v169_v29 = vmul.f32 %v190_v22, %v159_v27  ;;  %v171_v30 = vmul.f32 %v190_v22, %v161_v28 }
  0xec   :  { %174 = vst.msk [vmem:[%s286_s3 + $0x8] sm:$0xff] %vm18_vm0, %v170_v25  ;;  %176 = vst.msk [vmem:[%s286_s3 + $0x18] sm:$0xff] %vm18_vm0, %v172_v26 }
  0xed   :  { %173 = vst.msk [vmem:[%s286_s3] sm:$0xff] %vm18_vm0, %v169_v29  ;;  %175 = vst.msk [vmem:[%s286_s3 + $0x10] sm:$0xff] %vm18_vm0, %v171_v30 }

// kernel: tpu_custom_call.1
= control target key start
LH: loop header
LB: loop body
LE: loop exit
PB: predicated region body
PF: predicated region fallthrough
CT: control target
= control target key end

     0   :  { %v28_v0 = vlaneseq  ;;  %vm18_vm0 = vcmask 130048   ;;  %v215_v4 = vmov 0.0   ;;  %v216_v7 = vmov 1.0|1.0   ;;  %s283_s0 = inlined_call_operand.vmem [shape: s32[1,1,16], index: 0, kind: input, shape index: {}]   ;;  %s284_s2 = inlined_call_operand.vmem [shape: f32[32,16], index: 2, kind: input, shape index: {}]   ;;  %s285_s1 = inlined_call_operand.vmem [shape: f32[1,1,16], index: 1, kind: input, shape index: {}]   ;;  %s286_s3 = inlined_call_operand.vmem [shape: f32[32,16], index: 3, kind: output, shape index: {}]  }
   0x1   :  { %v181_v1 = vld [vmem:[%s283_s0] ss:$0 sm:$0xff]  ;;  %v26_v3 = vld [vmem:[%s284_s2 + $0x10] sm:$0xff]  ;;  %20 = vst.msk [vmem:[#allocation2 + $0x8] sm:$0xff] %vm18_vm0, %v215_v4  ;;  %19 = vst.msk [vmem:[#allocation2] sm:$0xff] %vm18_vm0, %v215_v4 }
   0x2   :  { %v24_v2 = vld [vmem:[%s284_s2] sm:$0xff]  ;;  %21 = vst.msk [vmem:[#allocation2 + $0x10] sm:$0xff] %vm18_vm0, %v215_v4  ;;  %22 = vst.msk [vmem:[#allocation2 + $0x18] sm:$0xff] %vm18_vm0, %v215_v4  ;;  %v29_v5 = vshrl.u32 %v28_v0, 7  ;;  %204 = vmatprep.mubr.msk.f32.mxu1 %vm18_vm0, %v26_v3  ;;  %v25_v8 = vld [vmem:[%s284_s2 + $0x8] sm:$0xff] }
   0x3   :  { %201 = vmatprep.mubr.msk.f32.mxu0 %vm18_vm0, %v24_v2  ;;  %v27_v9 = vld [vmem:[%s284_s2 + $0x18] sm:$0xff]  ;;  %v190_v22 = vld [vmem:[%s285_s1] ss:$0 sm:$0xff] }
   0x4   :  { %v30_v6 = vadd.s32 8, %v29_v5  ;;  %vm39_vm1 = vcmp.eq.s32.totalorder %v29_v5, %v181_v1 }
   0x6   :  { %vm40_vm2 = vcmp.eq.s32.totalorder %v30_v6, %v181_v1 }
   0x7   :  { %vm207_vm3 = vmpackc.low %vm40_vm2, %vm39_vm1 }
   0x8   :  { %208 = vmatprep.subr.msk.bf16.mxu0 %vm207_vm3, %v216_v7  ;;  %211 = vmatprep.subr.msk.bf16.mxu1 %vm207_vm3, %v216_v7  ;;  %v46_v10 = vld [vmem:[#allocation2 + $0x8] sm:$0xff]  ;;  %v45_v12 = vld [vmem:[#allocation2] sm:$0xff] }
   0x9   :  { %210 = vmatpush3.bf16.msk.msra.mxu0 %vm207_vm3, %v216_v7  ;;  %212 = vmatpush3.bf16.msk.msra.mxu1 %vm207_vm3, %v216_v7  ;;  %v48_v11 = vld [vmem:[#allocation2 + $0x18] sm:$0xff]  ;;  %v47_v13 = vld [vmem:[#allocation2 + $0x10] sm:$0xff] }
   0xc   :  { %202 = vmatmul.mubr.msk.f32.vlgmr.msra.gmra.mrb[0].mxu0 %vm18_vm0, %v25_v8  ;;  %205 = vmatmul.mubr.msk.f32.vlgmr.msra.gmra.mrb[0].mxu1 %vm18_vm0, %v27_v9 }
  0xdf   :  { %v203_v14 = vpop.f32.mrb[0].mxu0  ;;  %v206_v15 = vpop.f32.mrb[0].mxu1 }
  0xe0   :  { %v148_v16 = vadd.f32 %v203_v14, %v46_v10  ;;  %v150_v17 = vadd.f32 %v206_v15, %v48_v11  ;;  %v128_v18 = vpop.f32.mrb[1].mxu0  ;;  %v138_v19 = vpop.f32.mrb[1].mxu1 }
  0xe1   :  { %v147_v20 = vadd.f32 %v128_v18, %v45_v12  ;;  %v149_v21 = vadd.f32 %v138_v19, %v47_v13 }
  0xe2   :  { %152 = vst.msk [vmem:[#allocation2 + $0x8] sm:$0xff] %vm18_vm0, %v148_v16  ;;  %154 = vst.msk [vmem:[#allocation2 + $0x18] sm:$0xff] %vm18_vm0, %v150_v17 }
  0xe3   :  { %151 = vst.msk [vmem:[#allocation2] sm:$0xff] %vm18_vm0, %v147_v20  ;;  %153 = vst.msk [vmem:[#allocation2 + $0x10] sm:$0xff] %vm18_vm0, %v149_v21 }
  0xe9   :  { %v160_v23 = vld [vmem:[#allocation2 + $0x8] sm:$0xff]  ;;  %v162_v24 = vld [vmem:[#allocation2 + $0x18] sm:$0xff] }
  0xea   :  { %v170_v25 = vmul.f32 %v190_v22, %v160_v23  ;;  %v172_v26 = vmul.f32 %v190_v22, %v162_v24  ;;  %v159_v27 = vld [vmem:[#allocation2] sm:$0xff]  ;;  %v161_v28 = vld [vmem:[#allocation2 + $0x10] sm:$0xff] }
  0xeb   :  { %v169_v29 = vmul.f32 %v190_v22, %v159_v27  ;;  %v171_v30 = vmul.f32 %v190_v22, %v161_v28 }
  0xec   :  { %174 = vst.msk [vmem:[%s286_s3 + $0x8] sm:$0xff] %vm18_vm0, %v170_v25  ;;  %176 = vst.msk [vmem:[%s286_s3 + $0x18] sm:$0xff] %vm18_vm0, %v172_v26 }
  0xed   :  { %173 = vst.msk [vmem:[%s286_s3] sm:$0xff] %vm18_vm0, %v169_v29  ;;  %175 = vst.msk [vmem:[%s286_s3 + $0x10] sm:$0xff] %vm18_vm0, %v171_v30 }

</bundles_post_ra>
